<compile_context>
chip_gen: v6e
topology: v6e:2x2x1
jax: 0.10.0
libtpu: 0.0.40
codegen_flags: <defaults>
</compile_context>

<pallas_src>
import jax
import jax.numpy as jnp
from jax.experimental import pallas as pl
from jax.experimental.pallas import tpu as pltpu

_LANE = 1024         # lane-dense slab width (multiple of 128)
_BLOCK_ROWS = 1024   # rows per tile -> 1024*1024*4B = 4 MiB per f32 block
_VMEM_LIMIT = 32 * 1024 * 1024  # explicit scoped-VMEM limit, safe on v5e/v6e/v7x


def _scale_kernel(scale_ref, x_ref, o_ref):
    # scale_ref: (1,) f32 scalar in SMEM; x_ref / o_ref: (rows, 1024) VMEM tiles.
    s = scale_ref[0]                                   # hoisted scalar read
    o_ref[...] = (x_ref[...].astype(jnp.float32) * s).astype(o_ref.dtype)


def scale_layer(x: jax.Array, scale: jax.Array) -> jax.Array:
    """Apply out = x * scale with scale a scalar parameter (shape (1,))."""
    orig_shape = x.shape
    out_dtype = jnp.promote_types(x.dtype, jnp.float32)  # PyTorch-style promotion

    total = x.size
    if total == 0:
        return jnp.zeros(orig_shape, out_dtype)

    # Flatten completely and present a lane-dense (rows, 1024) slab.
    flat = x.reshape(-1)
    rows = pl.cdiv(total, _LANE)
    padded = rows * _LANE
    if padded != total:
        flat = jnp.pad(flat, (0, padded - total))
    x2d = flat.reshape(rows, _LANE)

    # Tile rows; if the whole slab is smaller than one tile, use the full extent
    # (a block equal to the full array dim is always layout-legal).
    block_rows = min(_BLOCK_ROWS, rows)
    grid = (pl.cdiv(rows, block_rows),)

    scale_smem = jnp.asarray(scale, dtype=jnp.float32).reshape(1)

    in_bytes = total * jnp.dtype(x.dtype).itemsize
    out_bytes = total * jnp.dtype(out_dtype).itemsize

    out2d = pl.pallas_call(
        _scale_kernel,
        out_shape=jax.ShapeDtypeStruct((rows, _LANE), out_dtype),
        grid=grid,
        in_specs=[
            pl.BlockSpec(memory_space=pltpu.SMEM),                    # scalar scale
            pl.BlockSpec((block_rows, _LANE), lambda i: (i, 0)),      # input tile
        ],
        out_specs=pl.BlockSpec((block_rows, _LANE), lambda i: (i, 0)),
        compiler_params=pltpu.CompilerParams(
            dimension_semantics=("parallel",),
            vmem_limit_bytes=_VMEM_LIMIT,
        ),
        cost_estimate=pl.CostEstimate(
            flops=total, transcendentals=0, bytes_accessed=in_bytes + out_bytes
        ),
    )(scale_smem, x2d)

    out_flat = out2d.reshape(-1)
    if padded != total:
        out_flat = out_flat[:total]
    return out_flat.reshape(orig_shape)


class ScaleLayer:
    """JAX/Pallas equivalent of the PyTorch ScaleLayer module."""

    def __init__(self, init_value: float = 1.0):
        # nn.Parameter(torch.FloatTensor([init_value])) -> shape (1,), float32
        self.scale = jnp.array([init_value], dtype=jnp.float32)

    def __call__(self, x: jax.Array) -> jax.Array:
        return scale_layer(x, self.scale)


if __name__ == "__main__":
    key = jax.random.PRNGKey(0)
    # NCHW input, as would feed an FCOS head branch.
    x = jax.random.normal(key, (2, 4, 16, 16), dtype=jnp.float32)

    layer = ScaleLayer(init_value=1.5)  # deterministic non-trivial scale
    out = layer(x)
    out = jax.block_until_ready(out)

    # Reference check against plain JAX.
    ref = x * layer.scale[0]
    assert out.shape == x.shape
    assert out.dtype == ref.dtype
    assert jnp.allclose(out, ref, atol=1e-6, rtol=1e-6)

    # Non-1024-divisible / odd-width case to cover the padding path.
    x_odd = jax.random.normal(jax.random.PRNGKey(1), (3, 5, 7, 19), dtype=jnp.float32)
    out_odd = jax.block_until_ready(layer(x_odd))
    assert jnp.allclose(out_odd, x_odd * layer.scale[0], atol=1e-6, rtol=1e-6)

    # bf16 input exercises the dtype-promotion path (bf16 * f32 param -> f32).
    x_bf16 = jax.random.normal(jax.random.PRNGKey(2), (2, 4, 16, 16)).astype(jnp.bfloat16)
    out_bf16 = jax.block_until_ready(layer(x_bf16))
    ref_bf16 = x_bf16.astype(jnp.float32) * layer.scale[0]
    assert out_bf16.dtype == jnp.float32
    assert jnp.allclose(out_bf16, ref_bf16, atol=1e-6, rtol=1e-6)

    print("KERNEL_OK")
</pallas_src>

<mosaic_0001>
module attributes {stable_mosaic.version = 11 : i64} {
  func.func @_scale_kernel(%arg0: i32, %arg1: memref<1xf32, #tpu.memory_space<smem>>, %arg2: memref<2x1024xf32, #tpu.memory_space<vmem>>, %arg3: memref<2x1024xf32, #tpu.memory_space<vmem>>) attributes {dimension_semantics = [#tpu.dimension_semantics<parallel>], iteration_bounds = array<i64: 1>, scalar_prefetch = 0 : i64, scratch_operands = 0 : i64, tpu.core_type = #tpu.core_type<tc>, window_params = [{transform_indices = @transform_0, window_bounds = array<i64: 1>}, {transform_indices = @transform_1, window_bounds = array<i64: 2, 1024>}, {transform_indices = @transform_2, window_bounds = array<i64: 2, 1024>}]} {
    %c0 = arith.constant 0 : index
    %0 = memref.load %arg1[%c0] : memref<1xf32, #tpu.memory_space<smem>>
    %c0_0 = arith.constant 0 : index
    %c0_1 = arith.constant 0 : index
    %1 = vector.load %arg2[%c0_0, %c0_1] : memref<2x1024xf32, #tpu.memory_space<vmem>>, vector<2x1024xf32>
    %2 = vector.broadcast %0 : f32 to vector<2x1024xf32>
    %3 = arith.mulf %1, %2 : vector<2x1024xf32>
    %c0_2 = arith.constant 0 : index
    %c0_3 = arith.constant 0 : index
    %4 = vector.load %arg3[%c0_2, %c0_3] : memref<2x1024xf32, #tpu.memory_space<vmem>>, vector<2x1024xf32>
    tpu.vector_store %arg3[%c0_2, %c0_3], %3 {strides = array<i32>} : memref<2x1024xf32, #tpu.memory_space<vmem>>, vector<2x1024xf32>,
    return
  }
  func.func @transform_0(%arg0: i32) -> i32 {
    %c0_i32 = arith.constant 0 : i32
    %c0_i32_0 = arith.constant 0 : i32
    return %c0_i32 : i32
  }
  func.func @transform_1(%arg0: i32) -> (i32, i32) {
    %c0_i32 = arith.constant 0 : i32
    %c0_i32_0 = arith.constant 0 : i32
    return %arg0, %c0_i32 : i32, i32
  }
  func.func @transform_2(%arg0: i32) -> (i32, i32) {
    %c0_i32 = arith.constant 0 : i32
    %c0_i32_0 = arith.constant 0 : i32
    return %arg0, %c0_i32 : i32, i32
  }
}

</mosaic_0001>

<bundles_post_ra>
// kernel: tpu_custom_call.1
= control target key start
LH: loop header
LB: loop body
LE: loop exit
PB: predicated region body
PF: predicated region fallthrough
CT: control target
= control target key end

     0   :  { %8 = vsyncpa [#allocation4], 0  ;;  %s120_s0 = inlined_call_operand.<no memory space> [shape: f32[1], index: 0, kind: input, shape index: {}]   ;;  %s121_s1 = inlined_call_operand.hbm [shape: f32[2,1024], index: 1, kind: input, shape index: {}]   ;;  %s122_s2 = inlined_call_operand.hbm [shape: f32[2,1024], index: 2, kind: output, shape index: {}]  }
   0x1   :  { %9 = vsyncpa [#allocation5], 0  ;;  %s94_s9 = smov [#allocation3]  }
   0x2   :  { %s18_s10 = sshll.u32 %s94_s9, 4  ;;  %s19_s10 = int_to_ptr.vmem [resolvable:$true] %s18_s10 }
   0x3   :  { %s58_s11 = scalar_lea.vmem %s19_s10, 256  ;;  %p63_p1 = scmp.lt.s32.totalorder %s19_s10, %s19_s10 }
   0x4   :  { %p59_p0 = scmp.ne.s32.totalorder %s19_s10, %s58_s11  ;;  %p64_p2 = scmp.lt.s32.totalorder %s58_s11, %s58_s11 }
   0x6   :  { %p65_p3 = por %p64_p2, %p63_p1 }
   0x8   :  { %p66_p4 = pnand %p65_p3, %p59_p0 }
   0xa   :  { %69 = shalt.err (!%p66_p4)
}
   0xb   :  { %21 = dma.hbm_to_vmem [thread:$0]  %s121_s1, 256, %s19_s10, [#allocation4]  }
   0xc   :  { %90 = dma.done.wait [#allocation4], 256  }
   0xd   :  { %91 = vsyncadd [#allocation4], 4294967040  ;;  %v28_v0 = vstv %s120_s0  ;;  %s95_s16 = smov [#allocation6]   ;;  %v26_v1 = vld [vmem:[#allocation3] sm:$0xff]  ;;  %v27_v2 = vld [vmem:[#allocation3 + $0x8] sm:$0xff] }
   0xe   :  { %s39_s17 = sshll.u32 %s95_s16, 4  ;;  %v29_v3 = vmul.f32 %v28_v0, %v26_v1  ;;  %v30_v4 = vmul.f32 %v28_v0, %v27_v2  ;;  %s40_s17 = int_to_ptr.vmem [resolvable:$true] %s39_s17 }
   0xf   :  { %s70_s18 = scalar_lea.vmem %s40_s17, 256  ;;  %p75_p6 = scmp.lt.s32.totalorder %s40_s17, %s40_s17 }
  0x10   :  { %31 = vst [vmem:[#allocation6] sm:$0xff] %v29_v3  ;;  %32 = vst [vmem:[#allocation6 + $0x8] sm:$0xff] %v30_v4  ;;  %p71_p5 = scmp.ne.s32.totalorder %s40_s17, %s70_s18  ;;  %p76_p7 = scmp.lt.s32.totalorder %s70_s18, %s70_s18 }
  0x12   :  { %p77_p8 = por %p76_p7, %p75_p6 }
  0x14   :  { %p78_p9 = pnand %p77_p8, %p71_p5 }
  0x16   :  { %81 = shalt.err (!%p78_p9)
}
  0x17   :  { %42 = dma.vmem_to_hbm [thread:$0]  %s40_s17, 256, %s122_s2, [#allocation5]  }
  0x18   :  { %92 = dma.done.wait [#allocation5], 256  }
  0x19   :  { %93 = vsyncadd [#allocation5], 4294967040 }
  0x1a   :  { %46 = vsyncpa [#allocation4], 1 }
  0x1b   :  { %47 = vsyncpa [#allocation5], 1 }

</bundles_post_ra>
